<compile_context>
chip_gen: v6e
topology: v6e:2x2x1
jax: 0.10.0
libtpu: 0.0.40
codegen_flags: <defaults>
</compile_context>

<pallas_src>
import jax
import jax.numpy as jnp
from jax.experimental import pallas as pl
from jax.experimental.pallas import tpu as pltpu

_LANES = 128
_SUBLANES = 8


def _vmem_capacity_bytes():
    """Physical VMEM per TensorCore; conservative fallback if the query fails."""
    try:
        info = pltpu.get_tpu_info()
        cap = getattr(info, "vmem_capacity_bytes", None)
        if cap:
            return int(cap)
    except Exception:
        pass
    return 64 << 20  # v7x per-TC VMEM (smallest of the targeted generations)


def _make_kernel(tr, rows, grouped, need_mask, cache_f32):
    """Build the per-(chunk, i) kernel body.

    d_ref:   (tr, 128) deep_feat chunk (native dtype, resident across the inner K steps)
    n_ref:   (tr, 128) chunk of reference tensor i (native dtype)
    o_ref:   (K, g, 128) partial sums of squares for this chunk (g = 8 grouped, else 1)
    d32_ref: optional (tr, 128) f32 scratch caching the cast of the deep_feat chunk.
    """

    def body(d_ref, n_ref, o_ref, d32_ref):
        i = pl.program_id(1)
        if cache_f32:
            # Cast the resident deep_feat tile once per chunk, reuse for all K steps.
            @pl.when(i == 0)
            def _():
                d32_ref[...] = d_ref[...].astype(jnp.float32)

            d32 = d32_ref[...]
        else:
            d32 = d_ref[...].astype(jnp.float32)  # no-op for f32 inputs

        # TODO(synk): on v7x a native-bf16 subtract (cast only the diff) would trim the
        # binding VALU slot further; kept exact cast-first f32 math for portability.
        diff = d32 - n_ref[...].astype(jnp.float32)
        sq = diff * diff

        if need_mask:
            # Ragged last chunk: rows past `rows` hold undefined boundary-block data.
            valid = rows - pl.program_id(0) * tr
            row_id = jax.lax.broadcasted_iota(jnp.int32, (tr, _LANES), 0)
            sq = jnp.where(row_id < valid, sq, jnp.float32(0.0))

        if grouped:
            # Vreg-group partial: pure VPU adds, full unmasked (8,128) store.
            o_ref[i] = jnp.sum(sq.reshape(tr // _SUBLANES, _SUBLANES, _LANES), axis=0)
        else:
            # Tiny single-chunk path (tr == rows < 16): plain sublane reduce.
            o_ref[i] = jnp.sum(sq, axis=0, keepdims=True)

    if cache_f32:
        def kernel(d_ref, n_ref, o_ref, d32_ref):
            body(d_ref, n_ref, o_ref, d32_ref)
    else:
        def kernel(d_ref, n_ref, o_ref):
            body(d_ref, n_ref, o_ref, None)
    return kernel


def _default_chunk_rows(itemsize, vmem_cap):
    # Resident budget: ~3/8 of physical VMEM, at most 48 MiB (leaves headroom for the
    # other operand's double buffer, f32 temporaries and the rest of the program).
    budget = min(vmem_cap * 3 // 8, 48 << 20)
    # Rough per-row VMEM cost: 2 double-buffered native-dtype tiles (d + n) plus the
    # cached-f32 deep_feat tile and ~2 f32 elementwise temporaries.
    per_row = _LANES * (4 * itemsize + 3 * 4)
    hard_cap = 8192 if itemsize >= 4 else 16384
    return max(_SUBLANES, min(hard_cap, (budget // per_row) // _SUBLANES * _SUBLANES))


def f_loss(deep_feat, n_stack, w, *, max_chunk_rows=None):
    """loss = sum_i w[i] * ||deep_feat - n_stack[i]||_F

    deep_feat: any shape; n_stack: (K, *deep_feat.shape); w: (K,).
    """
    K = n_stack.shape[0]
    total = deep_feat.size
    itemsize = deep_feat.dtype.itemsize

    d_flat = jnp.ravel(deep_feat)                 # layout-only reshape, native dtype
    n_flat = jnp.reshape(n_stack, (K, total))     # layout-only reshape, native dtype

    # Lane padding only in the rare lane-ragged case (CNN maps: total % 128 == 0).
    pad_lane = (-total) % _LANES
    if pad_lane:
        # TODO(synk): avoid re-materialising n here via an in-kernel lane mask on a
        # flat 1-D block; only hit when the flattened size isn't a multiple of 128.
        d_flat = jnp.pad(d_flat, (0, pad_lane))
        n_flat = jnp.pad(n_flat, ((0, 0), (0, pad_lane)))
    rows = (total + pad_lane) // _LANES

    vmem_cap = _vmem_capacity_bytes()
    if max_chunk_rows is None:
        max_chunk_rows = _default_chunk_rows(itemsize, vmem_cap)

    # --- choose tiling -------------------------------------------------------
    if rows < 2 * _SUBLANES:
        tr, r_chunks = rows, 1                    # tiny: single full-extent block
    else:
        # >= 2 chunks so the "parallel" chunk axis can feed both v7x TensorCores.
        r_chunks = max(2, pl.cdiv(rows, max_chunk_rows))
        tr = pl.cdiv(pl.cdiv(rows, r_chunks), _SUBLANES) * _SUBLANES
        r_chunks = pl.cdiv(rows, tr)

    grouped = (tr % _SUBLANES == 0)
    need_mask = (rows % tr != 0)                  # ragged last chunk -> in-kernel mask
    cache_f32 = jnp.dtype(deep_feat.dtype) != jnp.dtype(jnp.float32)
    g = _SUBLANES if grouped else 1

    d2 = d_flat.reshape(rows, _LANES)
    n3 = n_flat.reshape(K, rows, _LANES)

    # Explicit scoped-VMEM budget for the chosen tile (defaults are only 16/32 MiB).
    blk = tr * _LANES
    need = (4 * blk * itemsize                    # double-buffered d + n input tiles
            + (blk * 4 if cache_f32 else 0)       # cached f32 deep_feat tile
            + 2 * blk * 4                         # f32 elementwise temporaries
            + 2 * K * g * _LANES * 4)             # double-buffered output slab
    vmem_limit = int(min(vmem_cap * 7 // 8, max(need * 5 // 4, 32 << 20)))

    scratch_shapes = [pltpu.VMEM((tr, _LANES), jnp.float32)] if cache_f32 else []

    partials = pl.pallas_call(
        _make_kernel(tr, rows, grouped, need_mask, cache_f32),
        out_shape=jax.ShapeDtypeStruct((r_chunks, K, g, _LANES), jnp.float32),
        grid=(r_chunks, K),                       # chunk outer, K inner
        in_specs=[
            # deep_feat chunk: block index constant across the inner K steps
            # -> fetched from HBM once per chunk.
            pl.BlockSpec((tr, _LANES), lambda r, i: (r, 0)),
            # one chunk of reference tensor i per step (leading K dim squeezed).
            pl.BlockSpec((pl.Squeezed(), tr, _LANES), lambda r, i: (i, r, 0)),
        ],
        # one (K, g, 128) slab of partials per chunk; resident across the inner K
        # steps (each step fills its own row i), written back once per chunk.
        out_specs=pl.BlockSpec(
            (pl.Squeezed(), K, g, _LANES), lambda r, i: (r, 0, 0, 0)
        ),
        scratch_shapes=scratch_shapes,
        compiler_params=pltpu.CompilerParams(
            # No state carried across chunks -> chunk axis splits across TensorCores;
            # K revisits the resident deep_feat / output blocks -> arbitrary.
            dimension_semantics=("parallel", "arbitrary"),
            vmem_limit_bytes=vmem_limit,
        ),
    )(d2, n3)

    ssq = jnp.sum(partials, axis=(0, 2, 3))       # (K,) per-i sum of squares
    return jnp.sum(w.astype(jnp.float32) * jnp.sqrt(ssq))


def f_loss_ref(deep_feat, n_stack, w):
    d = deep_feat.astype(jnp.float32)
    loss = jnp.float32(0.0)
    for i in range(n_stack.shape[0]):
        diff = d - n_stack[i].astype(jnp.float32)
        loss = loss + w[i].astype(jnp.float32) * jnp.sqrt(jnp.sum(diff * diff))
    return loss


if __name__ == "__main__":
    key = jax.random.PRNGKey(0)
    k1, k2, k3 = jax.random.split(key, 3)

    B, C, H, W = 2, 4, 16, 16                     # deep_feat shape (NCHW)
    K = 3                                         # number of reference tensors in `n`

    deep_feat = jax.random.normal(k1, (B, C, H, W), dtype=jnp.float32)
    n_stack = jax.random.normal(k2, (K, B, C, H, W), dtype=jnp.float32)
    w = jax.random.uniform(k3, (K,), dtype=jnp.float32)

    ref = f_loss_ref(deep_feat, n_stack, w)

    # 1) default path: grid=(2, K), grouped (8,128) partials, no padding, no masking
    loss = f_loss(deep_feat, n_stack, w)
    jax.block_until_ready(loss)
    assert jnp.allclose(loss, ref, rtol=1e-5, atol=1e-5), (loss, ref)

    # 2) ragged row-chunk path (rows=20, tr=16 -> masked boundary block, no n pad)
    d5 = jax.random.normal(k1, (2, 5, 16, 16), dtype=jnp.float32)
    n5 = jax.random.normal(k2, (K, 2, 5, 16, 16), dtype=jnp.float32)
    ref5 = f_loss_ref(d5, n5, w)
    loss5 = f_loss(d5, n5, w)
    jax.block_until_ready(loss5)
    assert jnp.allclose(loss5, ref5, rtol=1e-5, atol=1e-5), (loss5, ref5)

    # 3) lane-ragged tiny path (total % 128 != 0 -> pad fallback, full-extent block)
    d7 = jax.random.normal(k1, (2, 3, 5, 7), dtype=jnp.float32)
    n7 = jax.random.normal(k2, (K, 2, 3, 5, 7), dtype=jnp.float32)
    ref7 = f_loss_ref(d7, n7, w)
    loss7 = f_loss(d7, n7, w)
    jax.block_until_ready(loss7)
    assert jnp.allclose(loss7, ref7, rtol=1e-5, atol=1e-5), (loss7, ref7)

    # 4) native bf16 streaming (cached f32 deep_feat scratch, cast inside the kernel)
    d_bf = deep_feat.astype(jnp.bfloat16)
    n_bf = n_stack.astype(jnp.bfloat16)
    ref_bf = f_loss_ref(d_bf, n_bf, w)
    loss_bf = f_loss(d_bf, n_bf, w)
    jax.block_until_ready(loss_bf)
    assert jnp.allclose(loss_bf, ref_bf, rtol=1e-3, atol=1e-3), (loss_bf, ref_bf)

    print("KERNEL_OK")
</pallas_src>

<mosaic_0001>
module attributes {stable_mosaic.version = 11 : i64} {
  func.func @kernel(%arg0: i32, %arg1: i32, %arg2: memref<8x128xf32, #tpu.memory_space<vmem>>, %arg3: memref<1x8x128xf32, #tpu.memory_space<vmem>>, %arg4: memref<1x3x8x128xf32, #tpu.memory_space<vmem>>) attributes {dimension_semantics = [#tpu.dimension_semantics<parallel>, #tpu.dimension_semantics<arbitrary>], iteration_bounds = array<i64: 2, 3>, scalar_prefetch = 0 : i64, scratch_operands = 0 : i64, tpu.core_type = #tpu.core_type<tc>, window_params = [{transform_indices = @transform_0, window_bounds = array<i64: 8, 128>}, {transform_indices = @transform_1, window_bounds = array<i64: 1, 8, 128>}, {transform_indices = @transform_2, window_bounds = array<i64: 1, 3, 8, 128>}]} {
    %c0 = arith.constant 0 : index
    %c0_0 = arith.constant 0 : index
    %0 = vector.load %arg2[%c0, %c0_0] : memref<8x128xf32, #tpu.memory_space<vmem>>, vector<8x128xf32>
    %c0_1 = arith.constant 0 : index
    %c0_2 = arith.constant 0 : index
    %c0_3 = arith.constant 0 : index
    %1 = vector.load %arg3[%c0_1, %c0_2, %c0_3] : memref<1x8x128xf32, #tpu.memory_space<vmem>>, vector<1x8x128xf32>
    %2 = vector.shape_cast %1 : vector<1x8x128xf32> to vector<8x128xf32>
    %3 = arith.subf %0, %2 : vector<8x128xf32>
    %4 = arith.mulf %3, %3 : vector<8x128xf32>
    %5 = vector.shape_cast %4 : vector<8x128xf32> to vector<1x8x128xf32>
    %cst = arith.constant dense<0.000000e+00> : vector<8x128xf32>
    %6 = vector.multi_reduction <add>, %5, %cst [0] : vector<1x8x128xf32> to vector<8x128xf32>
    %c0_4 = arith.constant 0 : index
    %7 = arith.index_cast %arg1 : i32 to index
    %c0_5 = arith.constant 0 : index
    %c0_6 = arith.constant 0 : index
    %8 = vector.load %arg4[%c0_4, %7, %c0_5, %c0_6] : memref<1x3x8x128xf32, #tpu.memory_space<vmem>>, vector<1x1x8x128xf32>
    %9 = vector.shape_cast %8 : vector<1x1x8x128xf32> to vector<8x128xf32>
    %10 = vector.shape_cast %6 : vector<8x128xf32> to vector<1x1x8x128xf32>
    tpu.vector_store %arg4[%c0_4, %7, %c0_5, %c0_6], %10 {strides = array<i32>} : memref<1x3x8x128xf32, #tpu.memory_space<vmem>>, vector<1x1x8x128xf32>,
    return
  }
  func.func @transform_0(%arg0: i32, %arg1: i32) -> (i32, i32) {
    %c0_i32 = arith.constant 0 : i32
    %c0_i32_0 = arith.constant 0 : i32
    return %arg0, %c0_i32 : i32, i32
  }
  func.func @transform_1(%arg0: i32, %arg1: i32) -> (i32, i32, i32) {
    %c0_i32 = arith.constant 0 : i32
    %c0_i32_0 = arith.constant 0 : i32
    return %arg1, %arg0, %c0_i32 : i32, i32, i32
  }
  func.func @transform_2(%arg0: i32, %arg1: i32) -> (i32, i32, i32, i32) {
    %c0_i32 = arith.constant 0 : i32
    %c0_i32_0 = arith.constant 0 : i32
    %c0_i32_1 = arith.constant 0 : i32
    %c0_i32_2 = arith.constant 0 : i32
    return %arg0, %c0_i32, %c0_i32_0, %c0_i32_1 : i32, i32, i32, i32
  }
}

</mosaic_0001>

<bundles_post_ra>
// kernel: tpu_custom_call.1
= control target key start
LH: loop header
LB: loop body
LE: loop exit
PB: predicated region body
PF: predicated region fallthrough
CT: control target
= control target key end

     0   :  { %s929_s0 = inlined_call_operand.hbm [shape: f32[16,128], index: 0, kind: input, shape index: {}]   ;;  %s930_s1 = inlined_call_operand.hbm [shape: f32[3,16,128], index: 1, kind: input, shape index: {}]   ;;  %s931_s2 = inlined_call_operand.hbm [shape: f32[2,3,8,128], index: 2, kind: output, shape index: {}]  }
   0x1   :  { %942 = sst [smem:[#allocation17_spill]] %s929_s0 }
   0x2   :  { %943 = sst [smem:[#allocation18_spill]] %s931_s2 }
   0x3   :  { %7 = vsyncpa [#allocation3], 0 }
   0x4   :  { %9 = vsyncpa [#allocation3 + $0x1], 0 }
   0x5   :  { %10 = vsyncpa [#allocation6], 0 }
   0x6   :  { %12 = vsyncpa [#allocation6 + $0x1], 0 }
   0x7   :  { %13 = vsyncpa [#allocation4], 0 }
   0x8   :  { %15 = vsyncpa [#allocation4 + $0x1], 0  ;;  %s674_s9 = smov 0   ;;  %s676_s10 = smov 0  }
   0x9   :  { %s678_s11 = smov 0   ;;  %s680_s12 = smov 0  }
   0xa   :  { %s682_s13 = smov 0   ;;  %s684_s14 = smov 0  }
   0xb   :  { %s686_s15 = smov 0   ;;  %s688_s16 = smov 0  }
   0xc   :  { %s690_s17 = smov 0   ;;  %s692_s18 = smov 0  }
   0xd   :  { %s694_s19 = smov 0  }
   0xe LB: > { %944 = sst [smem:[#allocation11_spill]] %s624_s12  ;;  %s345_s20 = sadd.s32 4294967295, %s652_s19   ;;  %s652_s19 = sphi %s694_s19, %s21_s19   ;;  %s648_s18 = sphi %s692_s18, %s981_s18   ;;  %s644_s17 = sphi %s690_s17, %s980_s17   ;;  %s640_s16 = sphi %s688_s16, %s979_s16   ;;  %s636_s15 = sphi %s686_s15, %s978_s15   ;;  %s632_s14 = sphi %s684_s14, %s977_s14   ;;  %s628_s13 = sphi %s682_s13, %s976_s13   ;;  %s624_s12 = sphi %s680_s12, %s975_s12   ;;  %s620_s11 = sphi %s678_s11, %s974_s11   ;;  %s616_s10 = sphi %s676_s10, %s973_s10   ;;  %s612_s9 = sphi %s674_s9, %s972_s9  }
   0xf   : > { %945 = sst [smem:[#allocation12_spill]] %s640_s16  ;;  %s346_s21 = sadd.s32 4294967294, %s652_s19  }
  0x10   : > { %s33_s22 = sadd.s32 1, %s648_s18  ;;  %p47_p0 = scmp.ne.s32.totalorder %s632_s14, %s628_s13 }
  0x11   : > { %p932_p1 = scmp.eq.s32.totalorder %s652_s19, 0  ;;  %p53_p2 = scmp.ne.s32.totalorder %s628_s13, %s624_s12 }
  0x12   : > { %p737_p3 = scmp.eq.s32.totalorder %s345_s20, 0  ;;  %p105_p5 = scmp.eq.s32.totalorder %s345_s20, 5 }
  0x13   : > { %p743_p4 = por %p932_p1, %p47_p0  ;;  %p111_p7 = scmp.eq.s32.totalorder %s346_s21, 5 }
  0x14   : > { %p749_p6 = por %p737_p3, %p53_p2  ;;  %p753_p8 = por %p105_p5, %p47_p0 }
  0x15   : > { %p757_p9 = por %p111_p7, %p53_p2  ;;  %p933_p10 = scmp.lt.s32.totalorder %s652_s19, 6 }
  0x16   : > { %s949_s26 = scalar_select %p753_p8, 1, 0 }
  0x17   : > { %s951_s27 = scalar_select %p757_p9, 1, 0 }
  0x18   : > { %950 = sst [smem:[#allocation13_spill]] %s949_s26  ;;  %s131_s28 = sand.u32 1, %s632_s14  }
  0x19   : > { %952 = sst [smem:[#allocation14_spill]] %s951_s27  ;;  %s350_s29 = sshll.u32 %s648_s18, 7 }
  0x1a   : > { %s349_s30 = sshll.u32 %s131_s28, 3  ;;  %s953_s0 = sld [smem:[#allocation17_spill]] }
  0x1b   : > { %s135_s6 = scalar_lea.vmem [#allocation2], %s349_s30  ;;  %p771_p11 = pnand %p933_p10, %p743_p4 }
  0x1c   : > { %s142_s7 = sshll.u32 %s135_s6, 4  ;;  %p354_p12 = scmp.ge.s32.totalorder %s652_s19, 1  ;;  %s143_s7 = int_to_ptr.vmem [resolvable:$true] %s142_s7 }
  0x1d   : > { %p167_p13 = scmp.lt.s32.totalorder %s652_s19, 7  ;;  %s132_s20 = scalar_lea.sflag [#allocation3], %s131_s28 }
  0x1e   : > { %p474_p0 = pneg %p771_p11  ;;  %s485_s21 = scalar_lea.vmem %s143_s7, 128 }
  0x1f   : > { %p486_p2 = scmp.ne.s32.totalorder %s143_s7, %s485_s21 }
  0x20   : > { %s140_s5 = scalar_lea.hbm %s953_s0, %s350_s29  ;;  %s654_s29 = smov [#allocation2]  }
  0x21   : > { %p488_p5 = pnand %p486_p2, %p474_p0  ;;  %s490_s30 = sshll.u32 %s654_s29, 4  ;;  %s491_s30 = int_to_ptr.vmem [resolvable:$false] %s490_s30 }
  0x22   : > { %s492_s24 = scalar_lea.vmem %s491_s30, 256  ;;  %p493_p1 = scmp.lt.s32.totalorder %s143_s7, %s491_s30 }
  0x23   : > { %p489_p7 = pneg %p488_p5  ;;  %p494_p4 = scmp.lt.s32.totalorder %s492_s24, %s485_s21 }
  0x25   : > { %p495_p10 = por %p494_p4, %p493_p1 }
  0x27   : > { %p496_p9 = pnand %p495_p10, %p489_p7 }
  0x29   : > { %499 = shalt.err (!%p496_p9)
}
  0x2a   : > { %372 = dma.hbm_to_vmem [thread:$0]  (!%p771_p11), %s140_s5, 128, %s143_s7, %s132_s20  }
  0x2b   : > { %p785_p1 = pnand %p354_p12, %p167_p13  ;;  %s30_s3 = sadd.s32 1, %s644_s17 }
  0x2c   : > { %s40_s4 = sadd.s32 1, %s632_s14  ;;  %p31_p9 = scmp.ge.s32.totalorder %s30_s3, 3 }
  0x2d   : > { %p75_p10 = scmp.ne.s32.totalorder %s620_s11, %s616_s10  ;;  %p81_p0 = scmp.ne.s32.totalorder %s616_s10, %s612_s9 }
  0x2e   : > { %s983_s3 = smov (%p31_p9, %s30_s3), 0  ;;  %s985_s22 = smov (!%p31_p9, %s33_s22), %s648_s18 }
  0x2f   : > { %956 = sst [smem:[#allocation15_spill]] %s983_s3  ;;  %s63_s5 = ssub.s32 %s644_s17, %s983_s3 }
  0x30   : > { %s68_s6 = sadd.s32 1, %s620_s11  ;;  %p35_p11 = scmp.ge.s32.totalorder %s985_s22, 2 }
  0x31   : > { %p805_p12 = por %p81_p0, %p737_p3  ;;  %p958_p13 = scmp.eq.s32.totalorder %s652_s19, 0 }
  0x32   : > { %s149_s9 = sand.u32 1, %s620_s11   ;;  %s987_s22 = smov (%p35_p11, %s985_s22), 0 }
  0x33   : > { %p811_p2 = por %p75_p10, %p958_p13  ;;  %960 = sst [smem:[#allocation16_spill]] %s987_s22 }
  0x34   : > { %s351_s20 = sshll.u32 %s149_s9, 3  ;;  %s352_s21 = sshll.u32 %s644_s17, 1 }
  0x35   : > { %s37_s29 = ssub.s32 %s648_s18, %s987_s22  ;;  %s158_s30 = sadd.s32 %s648_s18, %s352_s21 }
  0x36   : > { %p38_p5 = scmp.eq.s32.totalorder %s37_s29, 0  ;;  %s65_s23 = sor.u32 %s63_s5, %s37_s29 }
  0x37   : > { %p66_p3 = scmp.eq.s32.totalorder %s65_s23, 0  ;;  %s353_s3 = sshll.u32 %s158_s30, 7 }
  0x38   : > { %s823_s24 = scalar_select %p38_p5, %s632_s14, %s40_s4  }
  0x39   : > { %s826_s0 = scalar_select %p66_p3, %s620_s11, %s68_s6  }
  0x3a   : > { %s153_s27 = scalar_lea.vmem [#allocation5], %s351_s20  ;;  %s160_s16 = scalar_lea.hbm %s930_s1, %s353_s3 }
  0x3b   : > { %s162_s12 = sshll.u32 %s153_s27, 4  ;;  %p961_p7 = scmp.lt.s32.totalorder %s652_s19, 6  ;;  %s163_s12 = int_to_ptr.vmem [resolvable:$true] %s162_s12 }
  0x3c   : > { %s150_s5 = scalar_lea.sflag [#allocation6], %s149_s9  ;;  %s513_s4 = scalar_lea.vmem %s163_s12, 128 }
  0x3d   : > { %p835_p4 = pnand %p961_p7, %p811_p2  ;;  %p514_p10 = scmp.ne.s32.totalorder %s163_s12, %s513_s4 }
  0x3e   : > { %s655_s27 = smov [#allocation5]  }
  0x3f   : > { %p502_p9 = pneg %p835_p4  ;;  %s518_s6 = sshll.u32 %s655_s27, 4  ;;  %s519_s6 = int_to_ptr.vmem [resolvable:$false] %s518_s6 }
  0x40   : > { %s520_s2 = scalar_lea.vmem %s519_s6, 256  ;;  %p521_p13 = scmp.lt.s32.totalorder %s163_s12, %s519_s6 }
  0x41   : > { %p516_p0 = pnand %p514_p10, %p502_p9  ;;  %p522_p5 = scmp.lt.s32.totalorder %s520_s2, %s513_s4 }
  0x43   : > { %p517_p11 = pneg %p516_p0  ;;  %p523_p3 = por %p522_p5, %p521_p13 }
  0x45   : > { %p524_p8 = pnand %p523_p3, %p517_p11 }
  0x47   : > { %527 = shalt.err (!%p524_p8)
}
  0x48   : > { %375 = dma.hbm_to_vmem [thread:$0]  (!%p835_p4), %s160_s16, 128, %s163_s12, %s150_s5  }
  0x49   : > { %171 = sbr.rel (%p785_p1) target bundleno = 111 (0x6f), region = 28  ;;  %s846_s26 = sand.u32 (!%p785_p1), 1, %s628_s13  }
  0x4a   : > { %s355_s3 = sshll.u32 (!%p785_p1), %s846_s26, 3  ;;  %s174_s8 = scalar_lea.sflag (!%p785_p1), [#allocation3], %s846_s26 }
  0x4b   : > { %s177_s9 = scalar_lea.vmem (!%p785_p1), [#allocation2], %s355_s3 }
  0x4e   : > { %599 = dma.done.wait (%p749_p6), %s174_s8, 128  }
  0x4f   : > { %601 = vsyncadd (%p749_p6), %s174_s8, 4294967168  ;;  %s182_s12 = sand.u32 1, %s616_s10  }
  0x50   : > { %s356_s16 = sshll.u32 %s182_s12, 3  ;;  %s183_s22 = scalar_lea.sflag [#allocation6], %s182_s12 }
  0x51   : > { %s186_s28 = scalar_lea.vmem [#allocation5], %s356_s16 }
  0x52   : > { %603 = dma.done.wait (%p805_p12), %s183_s22, 128  }
  0x53   : > { %605 = vsyncadd (%p805_p12), %s183_s22, 4294967168  ;;  %s963_s20 = sld [smem:[#allocation12_spill]]  ;;  %s361_s21 = smul.u32 24, %s846_s26  ;;  %v212_v0 = vld [vmem:[%s177_s9] sm:$0xff]  ;;  %v213_v1 = vld [vmem:[%s186_s28] sm:$0xff] }
  0x54   : > { %s964_s29 = sld [smem:[#allocation13_spill]]  ;;  %s357_s23 = sshll.u32 %s636_s15, 3  ;;  %v214_v2 = vsub.f32 %v212_v0, %v213_v1 }
  0x55   : > { %s211_s25 = scalar_lea.vmem [#allocation7], %s361_s21  ;;  %s965_s6 = sld [smem:[#allocation18_spill]] }
  0x56   : > { %s234_s30 = sshll.u32 %s211_s25, 4  ;;  %s218_s4 = scalar_lea.vmem %s211_s25, %s357_s23 [#allocation7]  ;;  %v215_v3 = vmul.f32 %v214_v2, %v214_v2  ;;  %s862_s30 = int_to_ptr.vmem [resolvable:$true] %s234_s30 }
  0x57   : > { %s221_s15 = scalar_lea.sflag [#allocation4], %s846_s26  ;;  %s528_s3 = scalar_lea.vmem %s862_s30, 384 }
  0x58   : > { %219 = vst [vmem:[%s218_s4] sm:$0xff] %v215_v3  ;;  %p529_p6 = scmp.ne.s32.totalorder %s862_s30, %s528_s3  ;;  %s656_s8 = smov [#allocation7]  }
  0x59   : > { %s362_s5 = smul.u32 384, %s963_s20  ;;  %s532_s9 = sshll.u32 %s656_s8, 4  ;;  %s533_s9 = int_to_ptr.vmem [resolvable:$false] %s532_s9 }
  0x5a   : > { %p966_p8 = scmp.ne.s32.totalorder %s964_s29, 0  ;;  %s534_s12 = scalar_lea.vmem %s533_s9, 768 }
  0x5b   : > { %s867_s2 = scalar_lea.hbm %s965_s6, %s362_s5  ;;  %p535_p2 = scmp.lt.s32.totalorder %s862_s30, %s533_s9 }
  0x5c   : > { %p530_p1 = pnand %p529_p6, %p966_p8  ;;  %p536_p7 = scmp.lt.s32.totalorder %s534_s12, %s528_s3 }
  0x5e   : > { %p531_p12 = pneg %p530_p1  ;;  %p537_p4 = por %p536_p7, %p535_p2 }
  0x60   : > { %p538_p9 = pnand %p537_p4, %p531_p12 }
  0x62   : > { %541 = shalt.err (!%p538_p9)
}
  0x63   : > { %s542_s16 = scalar_lea.hbm %s867_s2, 384  ;;  %s546_s20 = scalar_lea.hbm %s965_s6, 768 }
  0x64   : > { %p543_p10 = scmp.ne.s32.totalorder %s867_s2, %s542_s16  ;;  %p547_p13 = scmp.lt.s32.totalorder %s867_s2, %s965_s6 }
  0x65   : > { %p548_p5 = scmp.lt.s32.totalorder %s546_s20, %s542_s16 }
  0x66   : > { %p544_p0 = pnand %p543_p10, %p966_p8 }
  0x67   : > { %p549_p3 = por %p548_p5, %p547_p13 }
  0x68   : > { %p545_p11 = pneg %p544_p0 }
  0x6a   : > { %p550_p6 = pnand %p549_p3, %p545_p11 }
  0x6c   : > { %553 = shalt.err (!%p550_p6)
}
  0x6d   : > { %s657_s25 = smov 128   ;;  %s658_s5 = smov 8  }
  0x6e   : > { %367 = dma.vmem_to_hbm [thread:$0]  (%p966_p8), %s862_s30, 384, %s867_s2, %s221_s15, %s657_s25, %s657_s25, %s658_s5  }
  0x6f PF: > { %s967_s4 = sld [smem:[#allocation11_spill]]  ;;  %p381_p1 = scmp.ge.s32.totalorder %s652_s19, 2 }
  0x70   : > { %s968_s7 = sld [smem:[#allocation14_spill]] }
  0x75   : > { %s249_s27 = sand.u32 1, %s967_s4  }
  0x76   : > { %p969_p12 = scmp.ne.s32.totalorder %s968_s7, 0  ;;  %s250_s3 = scalar_lea.sflag [#allocation4], %s249_s27 }
  0x78   : > { %p377_p2 = pnand %p381_p1, %p969_p12 }
  0x7a   : > { %p378_p7 = pneg %p377_p2 }
  0x7c   : > { %607 = dma.done.wait (%p378_p7), %s250_s3, 384  }
  0x7d   : > { %609 = vsyncadd (%p378_p7), %s250_s3, 4294966912  ;;  %s21_s19 = sadd.s32 1, %s652_s19   ;;  %s970_s26 = sld [smem:[#allocation15_spill]] }
  0x7e   : > { %p18_p4 = scmp.ge.s32.totalorder %s21_s19, 8   ;;  %s971_s29 = sld [smem:[#allocation16_spill]] }
  0x7f   : > { %s972_s9 = smov %s616_s10  ;;  %s973_s10 = smov %s620_s11 }
  0x80   : > { %s974_s11 = smov %s826_s0  ;;  %s975_s12 = smov %s628_s13 }
  0x81   : > { %s976_s13 = smov %s632_s14  ;;  %s977_s14 = smov %s823_s24 }
  0x82   : > { %s978_s15 = smov %s644_s17  ;;  %s979_s16 = smov %s648_s18 }
  0x83   : > { %s980_s17 = smov %s970_s26  ;;  %20 = sbr.rel (!%p18_p4) target bundleno = 14 (0xe), region = 87 }
  0x84   : > { %s981_s18 = smov %s971_s29 }
  0x88   :  { %255 = vsyncpa [#allocation3], 1 }
  0x89   :  { %257 = vsyncpa [#allocation3 + $0x1], 1 }
  0x8a   :  { %258 = vsyncpa [#allocation6], 1 }
  0x8b   :  { %260 = vsyncpa [#allocation6 + $0x1], 1 }
  0x8c   :  { %261 = vsyncpa [#allocation4], 1 }
  0x8d   :  { %263 = vsyncpa [#allocation4 + $0x1], 1 }

</bundles_post_ra>
